<compile_context>
chip_gen: v5e
topology: v5e:2x2
jax: 0.10.0
libtpu: 0.0.40
codegen_flags: <defaults>
</compile_context>

<pallas_src>
import jax
import jax.numpy as jnp
from jax.experimental import pallas as pl
from jax.experimental.pallas import tpu as pltpu

HEAD_DIMS = (2, 12, 9, 7, 10, 10, 19)  # coref, brand, color, materials, type, price, review
HEAD_TOTAL = sum(HEAD_DIMS)            # 69
HEAD_PAD = 128                         # lane-dense fused head output width
LANE = 128
SUBLANE = 8


def _round_up(x, m):
    return (x + m - 1) // m * m


def _furniture_head_kernel(x_ref, wa_ref, ba_ref, wh_ref, bh_ref, out_ref):
    # x: (TM, Dp), wa: (Dp, Dp), ba: (1, Dp), wh: (Dp, 128), bh: (1, 128)
    x = x_ref[...]
    aggregated = (
        jnp.dot(x, wa_ref[...], preferred_element_type=jnp.float32) + ba_ref[...]
    )
    # Match the weight dtype for the second MXU pass (bf16 weights -> bf16 lhs);
    # accumulation stays f32 via preferred_element_type, biases stay f32.
    aggregated = aggregated.astype(wh_ref.dtype)
    fused = (
        jnp.dot(aggregated, wh_ref[...], preferred_element_type=jnp.float32)
        + bh_ref[...]
    )
    out_ref[...] = fused.astype(out_ref.dtype)


def prepare_fused_params(params, *, compute_dtype=jnp.float32):
    """One-time parameter packing, hoisted out of the forward hot path.

    Concatenates the 7 head weights along the output axis, zero-pads the fused
    head matrix to 128 lane-dense columns, and zero-pads the feature dimension
    to a multiple of 128 lanes. Weights are cast to `compute_dtype` (use
    bfloat16 on v6e/v7x for MXU rate); biases stay float32.
    """
    wa = params["wa"]
    d = wa.shape[0]
    d_pad = _round_up(d, LANE)
    pad_d = d_pad - d

    wa_p = jnp.pad(wa, ((0, pad_d), (0, pad_d))).astype(compute_dtype)
    ba_p = jnp.pad(params["ba"], (0, pad_d)).reshape(1, d_pad).astype(jnp.float32)

    wh = jnp.concatenate([params[f"w{i}"] for i in range(len(HEAD_DIMS))], axis=1)
    bh = jnp.concatenate([params[f"b{i}"] for i in range(len(HEAD_DIMS))], axis=0)
    wh_p = jnp.pad(wh, ((0, pad_d), (0, HEAD_PAD - HEAD_TOTAL))).astype(compute_dtype)
    bh_p = (
        jnp.pad(bh, (0, HEAD_PAD - HEAD_TOTAL)).reshape(1, HEAD_PAD).astype(jnp.float32)
    )
    return {"wa": wa_p, "ba": ba_p, "wh": wh_p, "bh": bh_p}


def furniture_encoder_head(concat_vector, fused_params, *, tm=128):
    """concat_vector: (N, 2*hidden_dim) float32. Returns the 7-tuple of head logits."""
    n, d = concat_vector.shape
    wa = fused_params["wa"]
    ba = fused_params["ba"]
    wh = fused_params["wh"]
    bh = fused_params["bh"]
    d_pad = wa.shape[0]
    compute_dtype = wa.dtype

    # Cast in the wrapper: halves the per-row HBM traffic for the bf16 path.
    x = concat_vector.astype(compute_dtype)
    if d_pad != d:
        x = jnp.pad(x, ((0, 0), (0, d_pad - d)))

    # Batch (M) tiling: tiles of up to `tm` rows, padded to the sublane granule.
    tm_eff = min(tm, _round_up(n, SUBLANE))
    n_pad = _round_up(n, tm_eff)
    if n_pad != n:
        x = jnp.pad(x, ((0, n_pad - n), (0, 0)))
    grid = (pl.cdiv(n_pad, tm_eff),)

    # VMEM footprint estimate (double-buffered blocks). Only raise the scoped
    # limit when the smallest default (16 MiB on v5e) would not fit, with ~30%
    # headroom; never claim the whole physical VMEM.
    itemsize = jnp.dtype(compute_dtype).itemsize
    est = 2 * (
        tm_eff * d_pad * itemsize        # x tile
        + tm_eff * HEAD_PAD * 4          # output tile (f32)
        + d_pad * d_pad * itemsize       # resident aggregator weight
        + d_pad * HEAD_PAD * itemsize    # resident fused head weight
        + (d_pad + HEAD_PAD) * 4         # biases (f32)
    )
    est = int(est * 1.3)
    vmem_limit = est if est > (16 << 20) else None

    cost = pl.CostEstimate(
        flops=2 * n_pad * d_pad * (d_pad + HEAD_PAD),
        transcendentals=0,
        bytes_accessed=(
            n_pad * d_pad * itemsize
            + d_pad * (d_pad + HEAD_PAD) * itemsize
            + (d_pad + HEAD_PAD) * 4
            + n_pad * HEAD_PAD * 4
        ),
    )

    fused_out = pl.pallas_call(
        _furniture_head_kernel,
        out_shape=jax.ShapeDtypeStruct((n_pad, HEAD_PAD), jnp.float32),
        grid=grid,
        in_specs=[
            pl.BlockSpec((tm_eff, d_pad), lambda i: (i, 0)),     # x: batch-tiled
            pl.BlockSpec((d_pad, d_pad), lambda i: (0, 0)),      # Wa: resident
            pl.BlockSpec((1, d_pad), lambda i: (0, 0)),          # ba: resident
            pl.BlockSpec((d_pad, HEAD_PAD), lambda i: (0, 0)),   # Wh: resident
            pl.BlockSpec((1, HEAD_PAD), lambda i: (0, 0)),       # bh: resident
        ],
        out_specs=pl.BlockSpec((tm_eff, HEAD_PAD), lambda i: (i, 0)),
        compiler_params=pltpu.CompilerParams(
            dimension_semantics=("parallel",),   # shard batch tiles over TCs
            vmem_limit_bytes=vmem_limit,
        ),
        cost_estimate=cost,
    )(x, wa, ba, wh, bh)

    fused_out = fused_out[:n]
    outs = []
    off = 0
    for hd in HEAD_DIMS:
        outs.append(fused_out[:, off:off + hd])
        off += hd
    return tuple(outs)


def init_params(key, hidden_dim):
    d = 2 * hidden_dim
    params = {}
    key, ka, kba = jax.random.split(key, 3)
    bound = 1.0 / jnp.sqrt(d)
    params["wa"] = jax.random.uniform(ka, (d, d), jnp.float32, -bound, bound)
    params["ba"] = jax.random.uniform(kba, (d,), jnp.float32, -bound, bound)
    for i, hd in enumerate(HEAD_DIMS):
        key, kw, kb = jax.random.split(key, 3)
        params[f"w{i}"] = jax.random.uniform(kw, (d, hd), jnp.float32, -bound, bound)
        params[f"b{i}"] = jax.random.uniform(kb, (hd,), jnp.float32, -bound, bound)
    return params


def reference(concat_vector, params):
    agg = concat_vector @ params["wa"] + params["ba"]
    return tuple(agg @ params[f"w{i}"] + params[f"b{i}"] for i in range(len(HEAD_DIMS)))


if __name__ == "__main__":
    hidden_dim = 32          # -> concat_vector feature dim = 64
    batch = 8

    key = jax.random.PRNGKey(0)
    key, kx = jax.random.split(key)
    concat_vector = jax.random.normal(kx, (batch, 2 * hidden_dim), jnp.float32)
    params = init_params(key, hidden_dim)
    refs = reference(concat_vector, params)

    # f32 compute path (tight tolerance).
    fused_f32 = prepare_fused_params(params, compute_dtype=jnp.float32)
    outs = jax.block_until_ready(furniture_encoder_head(concat_vector, fused_f32))
    for o, r, hd in zip(outs, refs, HEAD_DIMS):
        assert o.shape == (batch, hd), (o.shape, hd)
        assert jnp.allclose(o, r, atol=1e-4, rtol=1e-4)

    # bf16-weight path (v6e/v7x MXU rate), f32 accumulation; looser tolerance.
    fused_bf16 = prepare_fused_params(params, compute_dtype=jnp.bfloat16)
    outs_bf16 = jax.block_until_ready(furniture_encoder_head(concat_vector, fused_bf16))
    for o, r, hd in zip(outs_bf16, refs, HEAD_DIMS):
        assert o.shape == (batch, hd), (o.shape, hd)
        assert jnp.allclose(o, r, atol=5e-2, rtol=5e-2)

    print("KERNEL_OK")
</pallas_src>

<mosaic_0001>
module attributes {stable_mosaic.version = 11 : i64} {
  func.func @_furniture_head_kernel(%arg0: i32, %arg1: memref<8x128xf32, #tpu.memory_space<vmem>>, %arg2: memref<128x128xf32, #tpu.memory_space<vmem>>, %arg3: memref<1x128xf32, #tpu.memory_space<vmem>>, %arg4: memref<128x128xf32, #tpu.memory_space<vmem>>, %arg5: memref<1x128xf32, #tpu.memory_space<vmem>>, %arg6: memref<8x128xf32, #tpu.memory_space<vmem>>) attributes {dimension_semantics = [#tpu.dimension_semantics<parallel>], iteration_bounds = array<i64: 1>, scalar_prefetch = 0 : i64, scratch_operands = 0 : i64, tpu.core_type = #tpu.core_type<tc>, window_params = [{transform_indices = @transform_0, window_bounds = array<i64: 8, 128>}, {pipeline_mode = #tpu.pipeline_mode<synchronous>, transform_indices = @transform_1, window_bounds = array<i64: 128, 128>}, {pipeline_mode = #tpu.pipeline_mode<synchronous>, transform_indices = @transform_2, window_bounds = array<i64: 1, 128>}, {pipeline_mode = #tpu.pipeline_mode<synchronous>, transform_indices = @transform_3, window_bounds = array<i64: 128, 128>}, {pipeline_mode = #tpu.pipeline_mode<synchronous>, transform_indices = @transform_4, window_bounds = array<i64: 1, 128>}, {transform_indices = @transform_5, window_bounds = array<i64: 8, 128>}]} {
    %c0 = arith.constant 0 : index
    %c0_0 = arith.constant 0 : index
    %0 = vector.load %arg1[%c0, %c0_0] : memref<8x128xf32, #tpu.memory_space<vmem>>, vector<8x128xf32>
    %c0_1 = arith.constant 0 : index
    %c0_2 = arith.constant 0 : index
    %1 = vector.load %arg2[%c0_1, %c0_2] : memref<128x128xf32, #tpu.memory_space<vmem>>, vector<128x128xf32>
    %cst = arith.constant dense<0.000000e+00> : vector<8x128xf32>
    %2 = tpu.matmul %0, %1, %cst {dimension_numbers = #tpu.dot_dimension_numbers<[1], [0], [0], [1], [0, 0, 1, 1], [], []>} : vector<8x128xf32>, vector<128x128xf32>, vector<8x128xf32> -> vector<8x128xf32>
    %c0_3 = arith.constant 0 : index
    %c0_4 = arith.constant 0 : index
    %3 = vector.load %arg3[%c0_3, %c0_4] : memref<1x128xf32, #tpu.memory_space<vmem>>, vector<1x128xf32>
    %4 = vector.broadcast %3 : vector<1x128xf32> to vector<8x128xf32>
    %5 = arith.addf %2, %4 : vector<8x128xf32>
    %c0_5 = arith.constant 0 : index
    %c0_6 = arith.constant 0 : index
    %6 = vector.load %arg4[%c0_5, %c0_6] : memref<128x128xf32, #tpu.memory_space<vmem>>, vector<128x128xf32>
    %cst_7 = arith.constant dense<0.000000e+00> : vector<8x128xf32>
    %7 = tpu.matmul %5, %6, %cst_7 {dimension_numbers = #tpu.dot_dimension_numbers<[1], [0], [0], [1], [0, 0, 1, 1], [], []>} : vector<8x128xf32>, vector<128x128xf32>, vector<8x128xf32> -> vector<8x128xf32>
    %c0_8 = arith.constant 0 : index
    %c0_9 = arith.constant 0 : index
    %8 = vector.load %arg5[%c0_8, %c0_9] : memref<1x128xf32, #tpu.memory_space<vmem>>, vector<1x128xf32>
    %9 = vector.broadcast %8 : vector<1x128xf32> to vector<8x128xf32>
    %10 = arith.addf %7, %9 : vector<8x128xf32>
    %c0_10 = arith.constant 0 : index
    %c0_11 = arith.constant 0 : index
    %11 = vector.load %arg6[%c0_10, %c0_11] : memref<8x128xf32, #tpu.memory_space<vmem>>, vector<8x128xf32>
    tpu.vector_store %arg6[%c0_10, %c0_11], %10 {strides = array<i32>} : memref<8x128xf32, #tpu.memory_space<vmem>>, vector<8x128xf32>,
    return
  }
  func.func @transform_0(%arg0: i32) -> (i32, i32) {
    %c0_i32 = arith.constant 0 : i32
    %c0_i32_0 = arith.constant 0 : i32
    return %arg0, %c0_i32 : i32, i32
  }
  func.func @transform_1(%arg0: i32) -> (i32, i32) {
    %c0_i32 = arith.constant 0 : i32
    %c0_i32_0 = arith.constant 0 : i32
    %c0_i32_1 = arith.constant 0 : i32
    return %c0_i32, %c0_i32_0 : i32, i32
  }
  func.func @transform_2(%arg0: i32) -> (i32, i32) {
    %c0_i32 = arith.constant 0 : i32
    %c0_i32_0 = arith.constant 0 : i32
    %c0_i32_1 = arith.constant 0 : i32
    return %c0_i32, %c0_i32_0 : i32, i32
  }
  func.func @transform_3(%arg0: i32) -> (i32, i32) {
    %c0_i32 = arith.constant 0 : i32
    %c0_i32_0 = arith.constant 0 : i32
    %c0_i32_1 = arith.constant 0 : i32
    return %c0_i32, %c0_i32_0 : i32, i32
  }
  func.func @transform_4(%arg0: i32) -> (i32, i32) {
    %c0_i32 = arith.constant 0 : i32
    %c0_i32_0 = arith.constant 0 : i32
    %c0_i32_1 = arith.constant 0 : i32
    return %c0_i32, %c0_i32_0 : i32, i32
  }
  func.func @transform_5(%arg0: i32) -> (i32, i32) {
    %c0_i32 = arith.constant 0 : i32
    %c0_i32_0 = arith.constant 0 : i32
    return %arg0, %c0_i32 : i32, i32
  }
}

</mosaic_0001>

<bundles_post_ra>
// kernel: tpu_custom_call.1
= control target key start
LH: loop header
LB: loop body
LE: loop exit
PB: predicated region body
PF: predicated region fallthrough
CT: control target
= control target key end

     0   :  { %10 = vsyncpa [#allocation3], 0  ;;  %s330_s0 = inlined_call_operand.hbm [shape: f32[8,128], index: 0, kind: input, shape index: {}]   ;;  %s331_s1 = inlined_call_operand.hbm [shape: f32[128,128], index: 1, kind: input, shape index: {}]   ;;  %s332_s2 = inlined_call_operand.vmem [shape: f32[1,128], index: 2, kind: input, shape index: {}]   ;;  %s333_s3 = inlined_call_operand.hbm [shape: f32[128,128], index: 3, kind: input, shape index: {}]   ;;  %s334_s4 = inlined_call_operand.vmem [shape: f32[1,128], index: 4, kind: input, shape index: {}]   ;;  %s335_s5 = inlined_call_operand.hbm [shape: f32[8,128], index: 5, kind: output, shape index: {}]  }
   0x1   :  { %11 = vsyncpa [#allocation6], 0  ;;  %s28_s20 = sshll.u32 %s331_s1, 4  ;;  %s29_s20 = int_to_ptr.hbm [resolvable:$true] %s28_s20 }
   0x2   :  { %12 = vsyncpa [#allocation4], 0  ;;  %s276_s21 = smov [#allocation5]   ;;  %s18_s25 = sshll.u32 %s330_s0, 4  ;;  %s19_s25 = int_to_ptr.hbm [resolvable:$true] %s18_s25 }
   0x3   :  { %s30_s22 = sshll.u32 %s276_s21, 4  ;;  %s277_s26 = smov 128   ;;  %s31_s22 = int_to_ptr.vmem [resolvable:$true] %s30_s22 }
   0x4   :  { %s278_s27 = smov 8   ;;  %s279_s28 = smov [#allocation2]  }
   0x5   :  { %36 = dma.hbm_to_vmem [thread:$0]  %s29_s20, 2048, %s31_s22, [#allocation6], %s277_s26, %s277_s26, %s278_s27  }
   0x6   :  { %s20_s29 = sshll.u32 %s279_s28, 4  ;;  %s43_s7 = sshll.u32 %s333_s3, 4  ;;  %s21_s29 = int_to_ptr.vmem [resolvable:$true] %s20_s29  ;;  %s44_s7 = int_to_ptr.hbm [resolvable:$true] %s43_s7 }
   0x7   :  { %23 = dma.hbm_to_vmem [thread:$0]  %s19_s25, 128, %s21_s29, [#allocation3]  }
   0x8   :  { %s280_s1 = smov [#allocation7]  }
   0x9   :  { %s45_s8 = sshll.u32 %s280_s1, 4  ;;  %s46_s8 = int_to_ptr.vmem [resolvable:$true] %s45_s8 }
   0xa   :  { %51 = dma.hbm_to_vmem [thread:$0]  %s44_s7, 2048, %s46_s8, [#allocation6], %s277_s26, %s277_s26, %s278_s27  }
   0xb   :  { %270 = dma.done.wait [#allocation3], 128  }
   0xc   :  { %271 = vsyncadd [#allocation3], 4294967168 }
   0xd   :  { %272 = dma.done.wait [#allocation6], 4096  }
   0xe   :  { %273 = vsyncadd [#allocation6], 4294963200  ;;  %v82_v0 = vld [vmem:[#allocation5 + $0x78] sm:$0xff]  ;;  %v81_v1 = vld [vmem:[#allocation5 + $0x70] sm:$0xff]  ;;  %s281_s11 = smov [#allocation8]   ;;  %s155_s15 = sshll.u32 %s335_s5, 4  ;;  %s156_s15 = int_to_ptr.hbm [resolvable:$true] %s155_s15 }
   0xf   :  { %87 = vmatpush.msra.mxu0 %v82_v0  ;;  %v80_v2 = vld [vmem:[#allocation5 + $0x68] sm:$0xff]  ;;  %v79_v3 = vld [vmem:[#allocation5 + $0x60] sm:$0xff]  ;;  %v122_v4 = vld [vmem:[#allocation7 + $0x78] sm:$0xff]  ;;  %s153_s12 = sshll.u32 %s281_s11, 4  ;;  %s154_s12 = int_to_ptr.vmem [resolvable:$true] %s153_s12 }
  0x10   :  { %v78_v5 = vld [vmem:[#allocation5 + $0x58] sm:$0xff]  ;;  %127 = vmatpush.msra.mxu1 %v122_v4  ;;  %v121_v6 = vld [vmem:[#allocation7 + $0x70] sm:$0xff]  ;;  %v120_v7 = vld [vmem:[#allocation7 + $0x68] sm:$0xff] }
  0x11   :  { %88 = vmatpush.msra.mxu0 %v81_v1  ;;  %v77_v8 = vld [vmem:[#allocation5 + $0x50] sm:$0xff]  ;;  %v119_v9 = vld [vmem:[#allocation7 + $0x60] sm:$0xff]  ;;  %v76_v10 = vld [vmem:[#allocation5 + $0x48] sm:$0xff] }
  0x12   :  { %128 = vmatpush.msra.mxu1 %v121_v6  ;;  %v118_v11 = vld [vmem:[#allocation7 + $0x58] sm:$0xff]  ;;  %v75_v12 = vld [vmem:[#allocation5 + $0x40] sm:$0xff]  ;;  %v117_v13 = vld [vmem:[#allocation7 + $0x50] sm:$0xff] }
  0x13   :  { %89 = vmatpush.msra.mxu0 %v80_v2  ;;  %v74_v14 = vld [vmem:[#allocation5 + $0x38] sm:$0xff]  ;;  %v116_v15 = vld [vmem:[#allocation7 + $0x48] sm:$0xff]  ;;  %v73_v16 = vld [vmem:[#allocation5 + $0x30] sm:$0xff] }
  0x14   :  { %129 = vmatpush.msra.mxu1 %v120_v7  ;;  %v115_v17 = vld [vmem:[#allocation7 + $0x40] sm:$0xff]  ;;  %v72_v18 = vld [vmem:[#allocation5 + $0x28] sm:$0xff]  ;;  %v114_v19 = vld [vmem:[#allocation7 + $0x38] sm:$0xff] }
  0x15   :  { %90 = vmatpush.msra.mxu0 %v79_v3  ;;  %v71_v20 = vld [vmem:[#allocation5 + $0x20] sm:$0xff]  ;;  %v113_v21 = vld [vmem:[#allocation7 + $0x30] sm:$0xff]  ;;  %v70_v22 = vld [vmem:[#allocation5 + $0x18] sm:$0xff] }
  0x16   :  { %130 = vmatpush.msra.mxu1 %v119_v9  ;;  %v112_v23 = vld [vmem:[#allocation7 + $0x28] sm:$0xff]  ;;  %v69_v24 = vld [vmem:[#allocation5 + $0x10] sm:$0xff]  ;;  %v111_v25 = vld [vmem:[#allocation7 + $0x20] sm:$0xff] }
  0x17   :  { %91 = vmatpush.msra.mxu0 %v78_v5  ;;  %v68_v26 = vld [vmem:[#allocation5 + $0x8] sm:$0xff]  ;;  %v110_v27 = vld [vmem:[#allocation7 + $0x18] sm:$0xff]  ;;  %v67_v28 = vld [vmem:[#allocation5] sm:$0xff] }
  0x18   :  { %131 = vmatpush.msra.mxu1 %v118_v11  ;;  %v66_v29 = vld [vmem:[#allocation2] sm:$0xff]  ;;  %v109_v30 = vld [vmem:[#allocation7 + $0x10] sm:$0xff]  ;;  %v108_v31 = vld [vmem:[#allocation7 + $0x8] sm:$0xff] }
  0x19   :  { %92 = vmatpush.msra.mxu0 %v77_v8  ;;  %v107_v32 = vld [vmem:[#allocation7] sm:$0xff]  ;;  %v172_v33 = vld [vmem:[%s332_s2] ss:$0 sm:$0xff] }
  0x1a   :  { %132 = vmatpush.msra.mxu1 %v117_v13  ;;  %v173_v36 = vld [vmem:[%s334_s4] ss:$0 sm:$0xff] }
  0x1b   :  { %93 = vmatpush.msra.mxu0 %v76_v10 }
  0x1c   :  { %133 = vmatpush.msra.mxu1 %v116_v15 }
  0x1d   :  { %94 = vmatpush.msra.mxu0 %v75_v12 }
  0x1e   :  { %134 = vmatpush.msra.mxu1 %v115_v17 }
  0x1f   :  { %95 = vmatpush.msra.mxu0 %v74_v14 }
  0x20   :  { %135 = vmatpush.msra.mxu1 %v114_v19 }
  0x21   :  { %96 = vmatpush.msra.mxu0 %v73_v16 }
  0x22   :  { %136 = vmatpush.msra.mxu1 %v113_v21 }
  0x23   :  { %97 = vmatpush.msra.mxu0 %v72_v18 }
  0x24   :  { %137 = vmatpush.msra.mxu1 %v112_v23 }
  0x25   :  { %98 = vmatpush.msra.mxu0 %v71_v20 }
  0x26   :  { %138 = vmatpush.msra.mxu1 %v111_v25 }
  0x27   :  { %99 = vmatpush.msra.mxu0 %v70_v22 }
  0x28   :  { %139 = vmatpush.msra.mxu1 %v110_v27 }
  0x29   :  { %100 = vmatpush.msra.mxu0 %v69_v24 }
  0x2a   :  { %140 = vmatpush.msra.mxu1 %v109_v30 }
  0x2b   :  { %101 = vmatpush.msra.mxu0 %v68_v26 }
  0x2c   :  { %141 = vmatpush.msra.mxu1 %v108_v31 }
  0x2d   :  { %102 = vmatpush.msra.mxu0 %v67_v28 }
  0x2e   :  { %103 = vmatmul.f32.vlgmr.msra.gmra.mxu0 %v66_v29  ;;  %142 = vmatpush.msra.mxu1 %v107_v32 }
  0xab   :  { %v104_v34 = vpop.f32.mrf.mxu0 }
  0xac   :  { %v105_v35 = vadd.f32 %v172_v33, %v104_v34 }
  0xae   :  { %143 = vmatmul.f32.vlgmr.msra.gmra.mxu1 %v105_v35 }
 0x12b   :  { %v144_v37 = vpop.f32.mrf.mxu1 }
 0x12c   :  { %v145_v38 = vadd.f32 %v173_v36, %v144_v37 }
 0x12e   :  { %147 = vst [vmem:[#allocation8] sm:$0xff] %v145_v38 }
 0x12f   :  { %158 = dma.vmem_to_hbm [thread:$0]  %s154_s12, 128, %s156_s15, [#allocation4]  }
 0x130   :  { %274 = dma.done.wait [#allocation4], 128  }
 0x131   :  { %275 = vsyncadd [#allocation4], 4294967168 }
 0x132   :  { %163 = vsyncpa [#allocation3], 1 }
 0x133   :  { %164 = vsyncpa [#allocation6], 1 }
 0x134   :  { %165 = vsyncpa [#allocation4], 1 }

</bundles_post_ra>
